<compile_context>
chip_gen: v7x
topology: tpu7x:2x2x1
jax: 0.10.0
libtpu: 0.0.40
codegen_flags: <defaults>
</compile_context>

<pallas_src>
import math

import jax
import jax.numpy as jnp
from jax.experimental import pallas as pl
from jax.experimental.pallas import tpu as pltpu


_RESEED = 8        # re-seed the trig recurrence with exact sin/cos every 8 harmonics
_LANE_CHUNK = 512  # inner compute chunk (lanes); multiple of 128


def _round_up(a, b):
    return (a + b - 1) // b * b


def _fourier_kernel(freq_ref, x_ref, coef_ref, o_ref, feats_ref):
    """One lane-major tile of rows, processed in lane chunks.

    freq_ref:  SMEM (1,)       base frequency 2*pi/P
    x_ref:     VMEM (IP, TM)   input features (zero-padded to IP rows), rows of
                               the flattened batch on the lane axis
    coef_ref:  VMEM (O, K)     [sin || cos] coeffs, each repeated IP times and
                               zeroed for padded features; K = 2*(N+1)*IP
    o_ref:     VMEM (O, TM)    output tile (transposed, lane-dense layout)
    feats_ref: VMEM (K, CH)    per-chunk harmonic-features scratch
    """
    ip, tm = x_ref.shape
    k, ch = feats_ref.shape
    np1 = k // (2 * ip)            # N + 1 (static)
    n_chunks = tm // ch            # static
    base = freq_ref[0]

    # Harmonic n = 0 rows are constant (sin = 0, cos = 1): write once per step.
    feats_ref[pl.ds(0, ip), :] = jnp.zeros((ip, ch), jnp.float32)
    feats_ref[pl.ds(np1 * ip, ip), :] = jnp.ones((ip, ch), jnp.float32)

    @pl.loop(0, n_chunks)
    def _(c):
        off = pl.multiple_of(c * ch, ch)
        x = x_ref[:, pl.ds(off, ch)].astype(jnp.float32)          # (IP, CH)
        if np1 >= 2:
            a = x * base                                          # base angle
            s_m2, c_m2 = jnp.zeros_like(x), jnp.ones_like(x)      # n = 0
            s_m1, c_m1 = jnp.sin(a), jnp.cos(a)                   # n = 1 (EUP)
            feats_ref[pl.ds(ip, ip), :] = s_m1
            feats_ref[pl.ds((np1 + 1) * ip, ip), :] = c_m1
            two_c1 = 2.0 * c_m1
            for n in range(2, np1):                               # static unroll
                if n % _RESEED == 0:                              # bound fp32 drift
                    s_n, c_n = jnp.sin(a * float(n)), jnp.cos(a * float(n))
                else:                                             # VPU-only recurrence
                    s_n = two_c1 * s_m1 - s_m2
                    c_n = two_c1 * c_m1 - c_m2
                feats_ref[pl.ds(n * ip, ip), :] = s_n
                feats_ref[pl.ds((np1 + n) * ip, ip), :] = c_n
                s_m2, s_m1 = s_m1, s_n
                c_m2, c_m1 = c_m1, c_n
        out = jnp.dot(coef_ref[...], feats_ref[...],
                      preferred_element_type=jnp.float32)         # (O, CH) on MXU
        o_ref[:, pl.ds(off, ch)] = out.astype(o_ref.dtype)        # lane-dense store


def fourier_layer(x, sin_coeffs, cos_coeffs, trig_coeffs, *, tile_m=8192,
                  out_dtype=None):
    """Pallas implementation of FourierLayer.forward.

    x:           (..., input_dim)
    sin_coeffs:  (output_dim, N+1)
    cos_coeffs:  (output_dim, N+1)
    trig_coeffs: (N+1,)  == 2*pi*arange(N+1)/P
    returns:     (..., output_dim), dtype follows x (or out_dtype if given)
    """
    lead_shape = x.shape[:-1]
    input_dim = x.shape[-1]
    output_dim, np1 = sin_coeffs.shape
    out_dtype = x.dtype if out_dtype is None else out_dtype

    x2 = x.reshape(-1, input_dim).astype(jnp.float32)
    m = x2.shape[0]

    ip = _round_up(input_dim, 8)                 # pad features to a full sublane tile
    k = 2 * np1 * ip                             # contraction length (128 for N = 7)

    # Rows live on the lane axis, so chunk/tile are multiples of 128.  The tile
    # is capped so the grid has >= 2 steps whenever rows allow (v7x megacore),
    # and M is zero-padded up to a whole number of tiles.
    ch = min(_LANE_CHUNK, _round_up(m, 128))
    half_rows = (m + 1) // 2
    tm = max(ch, min(_round_up(tile_m, ch), _round_up(half_rows, ch)))
    m_pad = _round_up(m, tm)
    grid = (m_pad // tm,)

    # Layout plumbing (cheap XLA ops): transpose + zero-pad rows / features.
    x_t = jnp.pad(x2.T, ((0, ip - input_dim), (0, m_pad - m)))        # (IP, m_pad)

    # [sin || cos] coefficients, each (o, n) entry repeated IP times so the whole
    # (harmonic, feature) contraction is one matmul.  Columns belonging to the
    # zero-padded features are zeroed (their cos(0)=1 rows must not contribute).
    feat_mask = (jnp.arange(ip) < input_dim).astype(jnp.float32)
    col_mask = jnp.tile(feat_mask, np1)[None, :]                      # (1, np1*IP)
    sin_rep = jnp.repeat(sin_coeffs.astype(jnp.float32), ip, axis=1) * col_mask
    cos_rep = jnp.repeat(cos_coeffs.astype(jnp.float32), ip, axis=1) * col_mask
    coef_big = jnp.concatenate([sin_rep, cos_rep], axis=1)            # (O, K)

    # Only the base frequency is read in-kernel; harmonics are integer multiples.
    if np1 >= 2:
        base_freq = trig_coeffs.astype(jnp.float32)[1:2]
    else:
        base_freq = jnp.zeros((1,), jnp.float32)

    out_bytes = jnp.dtype(out_dtype).itemsize
    cost = pl.CostEstimate(
        flops=2 * m_pad * output_dim * k + 6 * m_pad * ip * np1,
        transcendentals=2 * m_pad * ip * (1 + max(np1 - 2, 0) // _RESEED),
        bytes_accessed=(4 * ip * m_pad + out_bytes * output_dim * m_pad
                        + 4 * output_dim * k + 4),
    )

    out_t = pl.pallas_call(
        _fourier_kernel,
        out_shape=jax.ShapeDtypeStruct((output_dim, m_pad), out_dtype),
        grid_spec=pltpu.PrefetchScalarGridSpec(
            num_scalar_prefetch=1,                        # base_freq -> SMEM
            grid=grid,
            in_specs=[
                pl.BlockSpec((ip, tm), lambda i, f: (0, i)),
                pl.BlockSpec((output_dim, k), lambda i, f: (0, 0)),
            ],
            out_specs=pl.BlockSpec((output_dim, tm), lambda i, f: (0, i)),
            scratch_shapes=[pltpu.VMEM((k, ch), jnp.float32)],
        ),
        compiler_params=pltpu.CompilerParams(
            dimension_semantics=("parallel",)),           # row tiles shard across TCs
        cost_estimate=cost,
    )(base_freq, x_t, coef_big)

    # TODO(synk): for large M, fuse this (O, M) -> (M, O) transpose into the
    # consumer (or return the transposed layout directly) to avoid the extra
    # HBM round-trip in memory-bound settings.
    out2 = out_t[:, :m].T
    return out2.reshape(*lead_shape, output_dim).astype(out_dtype)


def fourier_layer_ref(x, sin_coeffs, cos_coeffs, trig_coeffs):
    """Pure-JAX reference matching the PyTorch forward exactly."""
    trig_inp = x[..., None] * trig_coeffs.reshape(*([1] * x.ndim), -1)
    trig_sin = jnp.einsum('...in,on->...o', jnp.sin(trig_inp), sin_coeffs)
    trig_cos = jnp.einsum('...in,on->...o', jnp.cos(trig_inp), cos_coeffs)
    return trig_sin + trig_cos


if __name__ == "__main__":
    # Module config (small, consistent with FourierLayer.__init__):
    input_dim = 4
    output_dim = 16
    N = 7            # N+1 = 8 fourier terms
    P = 1.0
    B, H = 2, 8      # x is (B, H, input_dim)

    key = jax.random.PRNGKey(0)
    kx, ks, kc = jax.random.split(key, 3)

    sin_coeffs = jax.random.normal(ks, (output_dim, N + 1), dtype=jnp.float32)
    cos_coeffs = jax.random.normal(kc, (output_dim, N + 1), dtype=jnp.float32)
    trig_coeffs = 2.0 * math.pi * jnp.arange(N + 1, dtype=jnp.float32) / P

    x = jax.random.normal(kx, (B, H, input_dim), dtype=jnp.float32)

    out = fourier_layer(x, sin_coeffs, cos_coeffs, trig_coeffs)
    out = jax.block_until_ready(out)

    ref = fourier_layer_ref(x, sin_coeffs, cos_coeffs, trig_coeffs)
    assert out.shape == (B, H, output_dim)
    # Tolerance accounts for tiny fp32 drift of the harmonic recurrence vs
    # direct sin/cos (|angle| up to ~2*pi*N*|x|).
    assert jnp.allclose(out, ref, atol=1e-3, rtol=1e-3), (
        float(jnp.max(jnp.abs(out - ref))))

    print("KERNEL_OK")
</pallas_src>

<mosaic_0001>
module attributes {stable_mosaic.version = 11 : i64} {
  func.func @_fourier_kernel(%arg0: i32, %arg1: memref<1xf32, #tpu.memory_space<smem>>, %arg2: memref<8x128xf32, #tpu.memory_space<vmem>>, %arg3: memref<16x128xf32, #tpu.memory_space<vmem>>, %arg4: memref<16x128xf32, #tpu.memory_space<vmem>>, %arg5: memref<128x128xf32, #tpu.memory_space<vmem>>) attributes {dimension_semantics = [#tpu.dimension_semantics<parallel>], iteration_bounds = array<i64: 1>, scalar_prefetch = 1 : i64, scratch_operands = 1 : i64, tpu.core_type = #tpu.core_type<tc>, window_params = [{transform_indices = @transform_0, window_bounds = array<i64: 8, 128>}, {pipeline_mode = #tpu.pipeline_mode<synchronous>, transform_indices = @transform_1, window_bounds = array<i64: 16, 128>}, {transform_indices = @transform_2, window_bounds = array<i64: 16, 128>}]} {
    %c0 = arith.constant 0 : index
    %0 = memref.load %arg1[%c0] : memref<1xf32, #tpu.memory_space<smem>>
    %cst = arith.constant 0.000000e+00 : f32
    %1 = vector.broadcast %cst : f32 to vector<8x128xf32>
    %c0_0 = arith.constant 0 : index
    %c0_1 = arith.constant 0 : index
    %2 = vector.load %arg5[%c0_0, %c0_1] : memref<128x128xf32, #tpu.memory_space<vmem>>, vector<8x128xf32>
    tpu.vector_store %arg5[%c0_0, %c0_1], %1 {strides = array<i32>} : memref<128x128xf32, #tpu.memory_space<vmem>>, vector<8x128xf32>,
    %cst_2 = arith.constant 1.000000e+00 : f32
    %3 = vector.broadcast %cst_2 : f32 to vector<8x128xf32>
    %c64 = arith.constant 64 : index
    %c0_3 = arith.constant 0 : index
    %4 = vector.load %arg5[%c64, %c0_3] : memref<128x128xf32, #tpu.memory_space<vmem>>, vector<8x128xf32>
    tpu.vector_store %arg5[%c64, %c0_3], %3 {strides = array<i32>} : memref<128x128xf32, #tpu.memory_space<vmem>>, vector<8x128xf32>,
    %c0_i32 = arith.constant 0 : i32
    %c1_i32 = arith.constant 1 : i32
    %5 = arith.muli %c0_i32, %c1_i32 : i32
    %c0_i32_4 = arith.constant 0 : i32
    %6 = arith.addi %c0_i32_4, %5 : i32
    %c128_i32 = arith.constant 128 : i32
    %7 = arith.muli %6, %c128_i32 : i32
    %8 = tpu.assume_multiple %7, 128 : i32
    %c0_5 = arith.constant 0 : index
    %9 = arith.index_cast %8 : i32 to index
    %10 = vector.load %arg2[%c0_5, %9] : memref<8x128xf32, #tpu.memory_space<vmem>>, vector<8x128xf32>
    %11 = vector.broadcast %0 : f32 to vector<8x128xf32>
    %12 = arith.mulf %10, %11 : vector<8x128xf32>
    %cst_6 = arith.constant 0.000000e+00 : f32
    %13 = vector.broadcast %cst_6 : f32 to vector<8x128xf32>
    %cst_7 = arith.constant 1.000000e+00 : f32
    %14 = vector.broadcast %cst_7 : f32 to vector<8x128xf32>
    %15 = math.sin %12 : vector<8x128xf32>
    %16 = math.cos %12 : vector<8x128xf32>
    %c8 = arith.constant 8 : index
    %c0_8 = arith.constant 0 : index
    %17 = vector.load %arg5[%c8, %c0_8] : memref<128x128xf32, #tpu.memory_space<vmem>>, vector<8x128xf32>
    tpu.vector_store %arg5[%c8, %c0_8], %15 {strides = array<i32>} : memref<128x128xf32, #tpu.memory_space<vmem>>, vector<8x128xf32>,
    %c72 = arith.constant 72 : index
    %c0_9 = arith.constant 0 : index
    %18 = vector.load %arg5[%c72, %c0_9] : memref<128x128xf32, #tpu.memory_space<vmem>>, vector<8x128xf32>
    tpu.vector_store %arg5[%c72, %c0_9], %16 {strides = array<i32>} : memref<128x128xf32, #tpu.memory_space<vmem>>, vector<8x128xf32>,
    %cst_10 = arith.constant 2.000000e+00 : f32
    %19 = vector.broadcast %cst_10 : f32 to vector<8x128xf32>
    %20 = arith.mulf %19, %16 : vector<8x128xf32>
    %21 = arith.mulf %20, %15 : vector<8x128xf32>
    %22 = arith.subf %21, %13 : vector<8x128xf32>
    %23 = arith.mulf %20, %16 : vector<8x128xf32>
    %24 = arith.subf %23, %14 : vector<8x128xf32>
    %c16 = arith.constant 16 : index
    %c0_11 = arith.constant 0 : index
    %25 = vector.load %arg5[%c16, %c0_11] : memref<128x128xf32, #tpu.memory_space<vmem>>, vector<8x128xf32>
    tpu.vector_store %arg5[%c16, %c0_11], %22 {strides = array<i32>} : memref<128x128xf32, #tpu.memory_space<vmem>>, vector<8x128xf32>,
    %c80 = arith.constant 80 : index
    %c0_12 = arith.constant 0 : index
    %26 = vector.load %arg5[%c80, %c0_12] : memref<128x128xf32, #tpu.memory_space<vmem>>, vector<8x128xf32>
    tpu.vector_store %arg5[%c80, %c0_12], %24 {strides = array<i32>} : memref<128x128xf32, #tpu.memory_space<vmem>>, vector<8x128xf32>,
    %27 = arith.mulf %20, %22 : vector<8x128xf32>
    %28 = arith.subf %27, %15 : vector<8x128xf32>
    %29 = arith.mulf %20, %24 : vector<8x128xf32>
    %30 = arith.subf %29, %16 : vector<8x128xf32>
    %c24 = arith.constant 24 : index
    %c0_13 = arith.constant 0 : index
    %31 = vector.load %arg5[%c24, %c0_13] : memref<128x128xf32, #tpu.memory_space<vmem>>, vector<8x128xf32>
    tpu.vector_store %arg5[%c24, %c0_13], %28 {strides = array<i32>} : memref<128x128xf32, #tpu.memory_space<vmem>>, vector<8x128xf32>,
    %c88 = arith.constant 88 : index
    %c0_14 = arith.constant 0 : index
    %32 = vector.load %arg5[%c88, %c0_14] : memref<128x128xf32, #tpu.memory_space<vmem>>, vector<8x128xf32>
    tpu.vector_store %arg5[%c88, %c0_14], %30 {strides = array<i32>} : memref<128x128xf32, #tpu.memory_space<vmem>>, vector<8x128xf32>,
    %33 = arith.mulf %20, %28 : vector<8x128xf32>
    %34 = arith.subf %33, %22 : vector<8x128xf32>
    %35 = arith.mulf %20, %30 : vector<8x128xf32>
    %36 = arith.subf %35, %24 : vector<8x128xf32>
    %c32 = arith.constant 32 : index
    %c0_15 = arith.constant 0 : index
    %37 = vector.load %arg5[%c32, %c0_15] : memref<128x128xf32, #tpu.memory_space<vmem>>, vector<8x128xf32>
    tpu.vector_store %arg5[%c32, %c0_15], %34 {strides = array<i32>} : memref<128x128xf32, #tpu.memory_space<vmem>>, vector<8x128xf32>,
    %c96 = arith.constant 96 : index
    %c0_16 = arith.constant 0 : index
    %38 = vector.load %arg5[%c96, %c0_16] : memref<128x128xf32, #tpu.memory_space<vmem>>, vector<8x128xf32>
    tpu.vector_store %arg5[%c96, %c0_16], %36 {strides = array<i32>} : memref<128x128xf32, #tpu.memory_space<vmem>>, vector<8x128xf32>,
    %39 = arith.mulf %20, %34 : vector<8x128xf32>
    %40 = arith.subf %39, %28 : vector<8x128xf32>
    %41 = arith.mulf %20, %36 : vector<8x128xf32>
    %42 = arith.subf %41, %30 : vector<8x128xf32>
    %c40 = arith.constant 40 : index
    %c0_17 = arith.constant 0 : index
    %43 = vector.load %arg5[%c40, %c0_17] : memref<128x128xf32, #tpu.memory_space<vmem>>, vector<8x128xf32>
    tpu.vector_store %arg5[%c40, %c0_17], %40 {strides = array<i32>} : memref<128x128xf32, #tpu.memory_space<vmem>>, vector<8x128xf32>,
    %c104 = arith.constant 104 : index
    %c0_18 = arith.constant 0 : index
    %44 = vector.load %arg5[%c104, %c0_18] : memref<128x128xf32, #tpu.memory_space<vmem>>, vector<8x128xf32>
    tpu.vector_store %arg5[%c104, %c0_18], %42 {strides = array<i32>} : memref<128x128xf32, #tpu.memory_space<vmem>>, vector<8x128xf32>,
    %45 = arith.mulf %20, %40 : vector<8x128xf32>
    %46 = arith.subf %45, %34 : vector<8x128xf32>
    %47 = arith.mulf %20, %42 : vector<8x128xf32>
    %48 = arith.subf %47, %36 : vector<8x128xf32>
    %c48 = arith.constant 48 : index
    %c0_19 = arith.constant 0 : index
    %49 = vector.load %arg5[%c48, %c0_19] : memref<128x128xf32, #tpu.memory_space<vmem>>, vector<8x128xf32>
    tpu.vector_store %arg5[%c48, %c0_19], %46 {strides = array<i32>} : memref<128x128xf32, #tpu.memory_space<vmem>>, vector<8x128xf32>,
    %c112 = arith.constant 112 : index
    %c0_20 = arith.constant 0 : index
    %50 = vector.load %arg5[%c112, %c0_20] : memref<128x128xf32, #tpu.memory_space<vmem>>, vector<8x128xf32>
    tpu.vector_store %arg5[%c112, %c0_20], %48 {strides = array<i32>} : memref<128x128xf32, #tpu.memory_space<vmem>>, vector<8x128xf32>,
    %51 = arith.mulf %20, %46 : vector<8x128xf32>
    %52 = arith.subf %51, %40 : vector<8x128xf32>
    %53 = arith.mulf %20, %48 : vector<8x128xf32>
    %54 = arith.subf %53, %42 : vector<8x128xf32>
    %c56 = arith.constant 56 : index
    %c0_21 = arith.constant 0 : index
    %55 = vector.load %arg5[%c56, %c0_21] : memref<128x128xf32, #tpu.memory_space<vmem>>, vector<8x128xf32>
    tpu.vector_store %arg5[%c56, %c0_21], %52 {strides = array<i32>} : memref<128x128xf32, #tpu.memory_space<vmem>>, vector<8x128xf32>,
    %c120 = arith.constant 120 : index
    %c0_22 = arith.constant 0 : index
    %56 = vector.load %arg5[%c120, %c0_22] : memref<128x128xf32, #tpu.memory_space<vmem>>, vector<8x128xf32>
    tpu.vector_store %arg5[%c120, %c0_22], %54 {strides = array<i32>} : memref<128x128xf32, #tpu.memory_space<vmem>>, vector<8x128xf32>,
    %c0_23 = arith.constant 0 : index
    %c0_24 = arith.constant 0 : index
    %57 = vector.load %arg3[%c0_23, %c0_24] : memref<16x128xf32, #tpu.memory_space<vmem>>, vector<16x128xf32>
    %c0_25 = arith.constant 0 : index
    %c0_26 = arith.constant 0 : index
    %58 = vector.load %arg5[%c0_25, %c0_26] : memref<128x128xf32, #tpu.memory_space<vmem>>, vector<128x128xf32>
    %cst_27 = arith.constant dense<0.000000e+00> : vector<16x128xf32>
    %59 = tpu.matmul %57, %58, %cst_27 {dimension_numbers = #tpu.dot_dimension_numbers<[1], [0], [0], [1], [0, 0, 1, 1], [], []>} : vector<16x128xf32>, vector<128x128xf32>, vector<16x128xf32> -> vector<16x128xf32>
    %c0_28 = arith.constant 0 : index
    %60 = arith.index_cast %8 : i32 to index
    %61 = vector.load %arg4[%c0_28, %60] : memref<16x128xf32, #tpu.memory_space<vmem>>, vector<16x128xf32>
    tpu.vector_store %arg4[%c0_28, %60], %59 {strides = array<i32>} : memref<16x128xf32, #tpu.memory_space<vmem>>, vector<16x128xf32>,
    %c1_i32_29 = arith.constant 1 : i32
    return
  }
  func.func @transform_0(%arg0: i32, %arg1: memref<1xf32, #tpu.memory_space<smem>>) -> (i32, i32) {
    %c0_i32 = arith.constant 0 : i32
    %c0_i32_0 = arith.constant 0 : i32
    return %c0_i32, %arg0 : i32, i32
  }
  func.func @transform_1(%arg0: i32, %arg1: memref<1xf32, #tpu.memory_space<smem>>) -> (i32, i32) {
    %c0_i32 = arith.constant 0 : i32
    %c0_i32_0 = arith.constant 0 : i32
    %c0_i32_1 = arith.constant 0 : i32
    return %c0_i32, %c0_i32_0 : i32, i32
  }
  func.func @transform_2(%arg0: i32, %arg1: memref<1xf32, #tpu.memory_space<smem>>) -> (i32, i32) {
    %c0_i32 = arith.constant 0 : i32
    %c0_i32_0 = arith.constant 0 : i32
    return %c0_i32, %arg0 : i32, i32
  }
}

</mosaic_0001>

<bundles_post_ra>
// kernel: tpu_custom_call.1
= control target key start
LH: loop header
LB: loop body
LE: loop exit
PB: predicated region body
PF: predicated region fallthrough
CT: control target
= control target key end

     0   :  { %9 = vsyncpa [#allocation6], 0  ;;  %s697_s0 = inlined_call_operand.<no memory space> [shape: f32[1], index: 0, kind: input, shape index: {}]   ;;  %s698_s1 = inlined_call_operand.hbm [shape: f32[8,128], index: 1, kind: input, shape index: {}]   ;;  %s699_s2 = inlined_call_operand.hbm [shape: f32[16,128], index: 2, kind: input, shape index: {}]   ;;  %s700_s3 = inlined_call_operand.hbm [shape: f32[16,128], index: 3, kind: output, shape index: {}]  }
   0x1   :  { %10 = vsyncpa [#allocation9], 0 }
   0x2   :  { %11 = vsyncpa [#allocation7], 0  ;;  %s591_s12 = smov [#allocation5]   ;;  %s592_s14 = smov [#allocation8]  }
   0x3   :  { %s18_s13 = sshll.u32 %s591_s12, 4  ;;  %s27_s15 = sshll.u32 %s592_s14, 4  ;;  %s19_s13 = int_to_ptr.vmem [resolvable:$true] %s18_s13  ;;  %s624_s15 = int_to_ptr.vmem [resolvable:$true] %s27_s15 }
   0x4   :  { %s519_s18 = scalar_lea.hbm %s698_s1, 128 }
   0x5   :  { %p520_p0 = scmp.ne.s32.totalorder %s698_s1, %s519_s18  ;;  %p523_p1 = scmp.lt.u32.totalorder %s519_s18, %s698_s1 }
   0x7   :  { %p525_p2 = pnand %p523_p1, %p520_p0 }
   0x9   :  { %528 = shalt.err (!%p525_p2)
}
   0xa   :  { %s529_s23 = scalar_lea.vmem %s19_s13, 128  ;;  %p534_p4 = scmp.lt.s32.totalorder %s19_s13, %s19_s13 }
   0xb   :  { %p530_p3 = scmp.ne.s32.totalorder %s19_s13, %s529_s23  ;;  %p535_p5 = scmp.lt.s32.totalorder %s529_s23, %s529_s23 }
   0xd   :  { %p536_p6 = por %p535_p5, %p534_p4 }
   0xf   :  { %p537_p7 = pnand %p536_p6, %p530_p3 }
  0x11   :  { %540 = shalt.err (!%p537_p7)
}
  0x12   :  { %21 = dma.hbm_to_vmem [thread:$0]  %s698_s1, 128, %s19_s13, [#allocation6]  }
  0x13   :  { %s541_s28 = scalar_lea.hbm %s699_s2, 256 }
  0x14   :  { %p542_p8 = scmp.ne.s32.totalorder %s699_s2, %s541_s28  ;;  %p545_p9 = scmp.lt.u32.totalorder %s541_s28, %s699_s2 }
  0x16   :  { %p547_p10 = pnand %p545_p9, %p542_p8 }
  0x18   :  { %550 = shalt.err (!%p547_p10)
}
  0x19   :  { %s551_s6 = scalar_lea.vmem %s624_s15, 256  ;;  %p556_p12 = scmp.lt.s32.totalorder %s624_s15, %s624_s15 }
  0x1a   :  { %p552_p11 = scmp.ne.s32.totalorder %s624_s15, %s551_s6  ;;  %p557_p13 = scmp.lt.s32.totalorder %s551_s6, %s551_s6 }
  0x1c   :  { %p558_p0 = por %p557_p13, %p556_p12 }
  0x1e   :  { %p559_p1 = pnand %p558_p0, %p552_p11 }
  0x20   :  { %562 = shalt.err (!%p559_p1)
}
  0x21   :  { %s593_s1 = smov 128   ;;  %s594_s7 = smov 8  }
  0x22   :  { %33 = dma.hbm_to_vmem [thread:$0]  %s699_s2, 256, %s624_s15, [#allocation9], %s593_s1, %s593_s1, %s594_s7  }
  0x23   :  { %585 = dma.done.wait [#allocation6], 128  }
  0x24   :  { %586 = vsyncadd [#allocation6], 4294967168 }
  0x25   :  { %587 = dma.done.wait [#allocation9], 256  }
  0x26   :  { %588 = vsyncadd [#allocation9], 4294967040  ;;  %v44_v0 = vstv %s697_s0  ;;  %v43_v1 = vld [vmem:[#allocation5] sm:$0xff]  ;;  %v291_v2 = vld [vmem:[#allocation8] sm:$0xff]  ;;  %v595_v15 = vmov 683565275  }
  0x27   :  { %v661_v3 = vmul.f32 %v44_v0, %v43_v1  ;;  %463 = vmatprep.mubr.f32.mxu0 %v291_v2  ;;  %v596_v17 = vmov 2475754826   ;;  %v597_v19 = vmov 2131351028   ;;  %v598_v21 = vmov 2102212464  }
  0x28   :  { %v599_v23 = vmov 920167782   ;;  %v600_v30 = vmov 1326507024   ;;  %s603_s0 = smov [#allocation10]  }
  0x29   :  { %v49_v4 = vand.u32 2139095040, %v661_v3  ;;  %v46_v6 = vand.u32 2147483647, %v661_v3  ;;  %vm48_vm7 = vcmp.lt.s32.totalorder %v661_v3, 0  ;;  %vm138_vm15 = vweird.f32 %v661_v3  ;;  %s391_s2 = sshll.u32 %s603_s0, 4  ;;  %s392_s2 = int_to_ptr.vmem [resolvable:$true] %s391_s2 }
  0x2a   :  { %s563_s12 = scalar_lea.vmem %s392_s2, 256  ;;  %p568_p3 = scmp.lt.s32.totalorder %s392_s2, %s392_s2 }
  0x2b   :  { %v50_v5 = vshrl.u32 %v49_v4, 23  ;;  %v53_v9 = vand.u32 8388607, %v46_v6  ;;  %vm47_vm8 = vcmp.le.f32.partialorder %v46_v6, 0.7853982  ;;  %p564_p2 = scmp.ne.s32.totalorder %s392_s2, %s563_s12  ;;  %p569_p4 = scmp.lt.s32.totalorder %s563_s12, %s563_s12 }
  0x2d   :  { %v404_v7 = vadd.s32 4294967169, %v50_v5  ;;  %v54_v12 = vor.u32 8388608, %v53_v9  ;;  %p570_p5 = por %p569_p4, %p568_p3 }
  0x2f   :  { %v56_v8 = vadd.s32 1, %v404_v7  ;;  %v94_v32 = vshll.u32 %v54_v12, 8  ;;  %p571_p6 = pnand %p570_p5, %p564_p2 }
  0x31   :  { %vm57_vm0 = vcmp.gt.s32.totalorder %v56_v8, 0 }
  0x32   :  { %v58_v10 = vsel %vm57_vm0, %v56_v8, 0 }
  0x33   :  { %v60_v11 = vand.u32 31, %v58_v10  ;;  %v59_v13 = vshrl.u32 %v58_v10, 5 }
  0x35   :  { %v61_v14 = vsub.s32 32, %v60_v11  ;;  %v63_v16 = vshll.u32 %v595_v15, %v60_v11  ;;  %v66_v18 = vshll.u32 %v596_v17, %v60_v11  ;;  %v69_v20 = vshll.u32 %v597_v19, %v60_v11 }
  0x36   :  { %v72_v22 = vshll.u32 %v598_v21, %v60_v11  ;;  %v75_v24 = vshll.u32 %v599_v23, %v60_v11  ;;  %vm78_vm1 = vcmp.lt.s32.totalorder %v59_v13, 1  ;;  %vm81_vm2 = vcmp.lt.s32.totalorder %v59_v13, 4 }
  0x37   :  { %v62_v25 = vshrl.u32 %v595_v15, %v61_v14  ;;  %v64_v26 = vshrl.u32 %v596_v17, %v61_v14  ;;  %v67_v27 = vshrl.u32 %v597_v19, %v61_v14  ;;  %v70_v28 = vshrl.u32 %v598_v21, %v61_v14 }
  0x38   :  { %v73_v29 = vshrl.u32 %v599_v23, %v61_v14  ;;  %v76_v31 = vshrl.u32 %v600_v30, %v61_v14  ;;  %vm79_vm3 = vcmp.lt.s32.totalorder %v59_v13, 2  ;;  %vm80_vm4 = vcmp.lt.s32.totalorder %v59_v13, 3 }
  0x39   :  { %v65_v33 = vor.u32 %v64_v26, %v63_v16  ;;  %v68_v34 = vor.u32 %v67_v27, %v66_v18  ;;  %v71_v35 = vor.u32 %v70_v28, %v69_v20 }
  0x3a   :  { %v74_v36 = vor.u32 %v73_v29, %v72_v22  ;;  %v77_v37 = vor.u32 %v76_v31, %v75_v24 }
  0x3b   :  { %v82_v38 = vsel %vm78_vm1, %v62_v25, %v65_v33  ;;  %v83_v39 = vsel %vm81_vm2, %v71_v35, 2102212464  ;;  %v86_v40 = vsel %vm78_vm1, %v65_v33, %v68_v34  ;;  %v90_v41 = vsel %vm78_vm1, %v68_v34, %v71_v35 }
  0x3c   :  { %v84_v42 = vsel %vm80_vm4, %v68_v34, %v83_v39  ;;  %v87_v43 = vsel %vm81_vm2, %v74_v36, 920167782  ;;  %v91_v44 = vsel %vm81_vm2, %v77_v37, 1326507024 }
  0x3d   :  { %v88_v45 = vsel %vm80_vm4, %v71_v35, %v87_v43  ;;  %v92_v46 = vsel %vm80_vm4, %v74_v36, %v91_v44  ;;  %v85_v47 = vsel %vm79_vm3, %v82_v38, %v84_v42  ;;  %v601_v38 = vmov 0.0  }
  0x3e   :  { %v89_v48 = vsel %vm79_vm3, %v86_v40, %v88_v45  ;;  %v93_v49 = vsel %vm79_vm3, %v90_v41, %v92_v46  ;;  %v101_v54 = vmul.u32 %v94_v32, %v85_v47 }
  0x3f   :  { %v667_v50 = vmul.u32.u64.low %v94_v32, %v93_v49  ;;  %v668_v51 = vmul.u32.u64.high %v94_v32, %v93_v49, %v667_v50  ;;  %v670_v52 = vmul.u32.u64.low %v94_v32, %v89_v48  ;;  %v671_v53 = vmul.u32.u64.high %v94_v32, %v89_v48, %v670_v52 }
  0x41   :  { %vm103_vm5 = vc.u32 %v668_v51, %v670_v52  ;;  %v104_v55 = vadd.s32 1, %v671_v53  ;;  %v102_v2 = vadd.s32 %v670_v52, %v668_v51 }
  0x43   :  { %v105_v56 = vsel %vm103_vm5, %v104_v55, %v671_v53 }
  0x44   :  { %v106_v57 = vadd.s32 %v105_v56, %v101_v54 }
  0x46   :  { %v107_v58 = vadd.s32 536870912, %v106_v57 }
  0x48   :  { %v108_v59 = vshrl.u32 %v107_v58, 30 }
  0x4a   :  { %v109_v60 = vshll.u32 %v108_v59, 30  ;;  %v132_v16 = vsub.s32 4, %v108_v59 }
  0x4c   :  { %v110_v61 = vsub.s32 %v106_v57, %v109_v60  ;;  %v133_v19 = vsel %vm48_vm7, %v132_v16, %v108_v59 }
  0x4d   :  { %v135_v22 = vsel %vm47_vm8, 0, %v133_v19 }
  0x4e   :  { %v112_v62 = vsub.s32 0, %v110_v61  ;;  %v139_v23 = vadd.s32 3, %v135_v22  ;;  %v243_v25 = vand.u32 3, %v135_v22 }
  0x50   :  { %v405_v63 = vmin.u32 %v112_v62, %v110_v61  ;;  %v140_v24 = vand.u32 3, %v139_v23  ;;  %vm248_vm10 = vcmp.eq.s32.totalorder %v243_v25, 2  ;;  %vm245_vm12 = vcmp.eq.s32.totalorder %v243_v25, 0 }
  0x51   :  { %vm244_vm14 = vcmp.lt.s32.totalorder %v243_v25, 2  ;;  %v602_v62 = vmov 1.0  }
  0x52   :  { %v114_v0 = vclz %v405_v63  ;;  %vm145_vm9 = vcmp.eq.s32.totalorder %v140_v24, 2  ;;  %vm142_vm11 = vcmp.eq.s32.totalorder %v140_v24, 0  ;;  %vm141_vm13 = vcmp.lt.s32.totalorder %v140_v24, 2 }
  0x54   :  { %v406_v1 = vadd.s32 4294967294, %v114_v0 }
  0x56   :  { %vm407_vm6 = vcmp.lt.s32.totalorder %v406_v1, 0 }
  0x57   :  { %v117_v4 = vsel %vm407_vm6, 0, %v406_v1 }
  0x58   :  { %v118_v5 = vsub.s32 32, %v117_v4  ;;  %v119_v7 = vshll.u32 %v110_v61, %v117_v4  ;;  %v122_v8 = vsub.s32 4294967266, %v117_v4 }
  0x5a   :  { %v120_v9 = vshrl.u32 %v102_v2, %v118_v5  ;;  %v123_v10 = vadd.s32 127, %v122_v8  ;;  %v292_v8 = vld [vmem:[#allocation8 + $0x8] sm:$0xff] }
  0x5c   :  { %v121_v11 = vor.u32 %v120_v9, %v119_v7  ;;  %v124_v12 = vshll.u32 %v123_v10, 23 }
  0x5e   :  { %v125_v13 = vor.u32 4788187, %v124_v12  ;;  %v128_v14 = vcvt.s32.f32 %v121_v11 }
  0x60   :  { %v126_v15 = vand.u32 2147483647, %v125_v13 }
  0x62   :  { %v129_v17 = vmul.f32 %v128_v14, %v126_v15 }
  0x64   :  { %v130_v18 = vxor.u32 2147483648, %v129_v17 }
  0x66   :  { %v131_v20 = vsel %vm48_vm7, %v130_v18, %v129_v17 }
  0x67   :  { %v134_v21 = vsel %vm47_vm8, %v661_v3, %v131_v20 }
  0x68   :  { %515 = vcosq.f32 %v134_v21 }
  0x69   :  { %517 = vsinq.f32 %v134_v21 }
  0x72   :  { %v516_v26 = vpop.eup %515 }
  0x73   :  { %v518_v27 = vpop.eup %517  ;;  %v146_v28 = vxor.u32 2147483648, %v516_v26 }
  0x74   :  { %v143_v6 = vxor.u32 2147483648, %v518_v27 }
  0x75   :  { %v147_v29 = vsel %vm145_vm9, %v146_v28, %v518_v27  ;;  %v250_v30 = vsel %vm248_vm10, %v146_v28, %v518_v27 }
  0x76   :  { %v144_v31 = vsel %vm142_vm11, %v516_v26, %v143_v6  ;;  %v247_v32 = vsel %vm245_vm12, %v516_v26, %v143_v6 }
  0x77   :  { %v148_v33 = vsel %vm141_vm13, %v144_v31, %v147_v29  ;;  %v251_v34 = vsel %vm244_vm14, %v247_v32, %v250_v30 }
  0x78   :  { %v149_v35 = vsel %vm138_vm15, nan, %v148_v33  ;;  %v252_v36 = vsel %vm138_vm15, nan, %v251_v34 }
  0x79   :  { %v255_v37 = vmul.f32 2.0, %v252_v36  ;;  %v466_v39 = vpack.c.bf16 %v149_v35, %v601_v38  ;;  %v482_v63 = vpack.c.bf16 %v252_v36, %v602_v62 }
  0x7b   :  { %v256_v40 = vmul.f32 %v255_v37, %v149_v35  ;;  %467 = vmatprep.subr.bf16.mxu0 %v466_v39  ;;  %v257_v41 = vmul.f32 %v255_v37, %v252_v36 }
  0x7c   :  { %469 = vmatpush3.bf16.msra.mxu0 %v466_v39 }
  0x7d   :  { %v261_v42 = vmul.f32 %v256_v40, %v255_v37  ;;  %v412_v43 = vadd.f32 -1.0, %v257_v41 }
  0x7f   :  { %v262_v44 = vsub.f32 %v261_v42, %v149_v35  ;;  %v263_v45 = vmul.f32 %v412_v43, %v255_v37 }
  0x81   :  { %v470_v3 = vpack.c.bf16 %v262_v44, %v256_v40  ;;  %v267_v46 = vmul.f32 %v262_v44, %v255_v37  ;;  %v264_v47 = vsub.f32 %v263_v45, %v252_v36 }
  0x83   :  { %471 = vmatprep.subr.bf16.mxu0 %v470_v3  ;;  %v268_v48 = vsub.f32 %v267_v46, %v256_v40  ;;  %v269_v49 = vmul.f32 %v264_v47, %v255_v37  ;;  %v486_v1 = vpack.c.bf16 %v264_v47, %v412_v43 }
  0x84   :  { %473 = vmatpush3.bf16.msra.mxu0 %v470_v3 }
  0x85   :  { %v273_v50 = vmul.f32 %v268_v48, %v255_v37  ;;  %v270_v51 = vsub.f32 %v269_v49, %v412_v43 }
  0x87   :  { %v274_v52 = vsub.f32 %v273_v50, %v262_v44  ;;  %v275_v53 = vmul.f32 %v270_v51, %v255_v37 }
  0x89   :  { %v474_v54 = vpack.c.bf16 %v274_v52, %v268_v48  ;;  %v279_v55 = vmul.f32 %v274_v52, %v255_v37  ;;  %v276_v56 = vsub.f32 %v275_v53, %v264_v47 }
  0x8b   :  { %475 = vmatprep.subr.bf16.mxu0 %v474_v54  ;;  %v280_v57 = vsub.f32 %v279_v55, %v268_v48  ;;  %v281_v59 = vmul.f32 %v276_v56, %v255_v37  ;;  %v490_v4 = vpack.c.bf16 %v276_v56, %v270_v51 }
  0x8c   :  { %477 = vmatpush3.bf16.msra.mxu0 %v474_v54 }
  0x8d   :  { %v285_v58 = vmul.f32 %v280_v57, %v255_v37  ;;  %v282_v0 = vsub.f32 %v281_v59, %v270_v51 }
  0x8f   :  { %v286_v60 = vsub.f32 %v285_v58, %v274_v52  ;;  %v287_v2 = vmul.f32 %v282_v0, %v255_v37 }
  0x91   :  { %v478_v61 = vpack.c.bf16 %v286_v60, %v280_v57  ;;  %v288_v5 = vsub.f32 %v287_v2, %v276_v56 }
  0x93   :  { %479 = vmatprep.subr.bf16.mxu0 %v478_v61  ;;  %v494_v7 = vpack.c.bf16 %v288_v5, %v282_v0 }
  0x94   :  { %481 = vmatpush3.bf16.msra.mxu0 %v478_v61 }
  0x95   :  { %483 = vmatprep.subr.bf16.mxu0 %v482_v63 }
  0x98   :  { %485 = vmatpush3.bf16.msra.mxu0 %v482_v63 }
  0x99   :  { %487 = vmatprep.subr.bf16.mxu0 %v486_v1 }
  0x9c   :  { %489 = vmatpush3.bf16.msra.mxu0 %v486_v1 }
  0x9d   :  { %491 = vmatprep.subr.bf16.mxu0 %v490_v4 }
  0xa0   :  { %493 = vmatpush3.bf16.msra.mxu0 %v490_v4 }
  0xa1   :  { %495 = vmatprep.subr.bf16.mxu0 %v494_v7 }
  0xa4   :  { %497 = vmatpush3.bf16.msra.mxu0 %v494_v7 }
  0xa7   :  { %464 = vmatmul.mubr.f32.vlgmr.msra.gmra.mrb[0].mxu0 %v292_v8 }
 0x17a   :  { %v465_v9 = vpop.f32.mrb[0].mxu0 }
 0x17b   :  { %385 = vst [vmem:[#allocation10 + $0x8] sm:$0xff] %v465_v9  ;;  %v375_v10 = vpop.f32.mrb[1].mxu0 }
 0x17c   :  { %384 = vst [vmem:[#allocation10] sm:$0xff] %v375_v10 }
 0x17d   :  { %574 = shalt.err (!%p571_p6)
}
 0x17e   :  { %s575_s15 = scalar_lea.hbm %s700_s3, 256 }
 0x17f   :  { %p576_p7 = scmp.ne.s32.totalorder %s700_s3, %s575_s15  ;;  %p579_p8 = scmp.lt.u32.totalorder %s575_s15, %s700_s3 }
 0x181   :  { %p581_p9 = pnand %p579_p8, %p576_p7 }
 0x183   :  { %584 = shalt.err (!%p581_p9)
}
 0x184   :  { %397 = dma.vmem_to_hbm [thread:$0]  %s392_s2, 256, %s700_s3, [#allocation7], %s593_s1, %s593_s1, %s594_s7  }
 0x185   :  { %589 = dma.done.wait [#allocation7], 256  }
 0x186   :  { %590 = vsyncadd [#allocation7], 4294967040 }
 0x187   :  { %401 = vsyncpa [#allocation6], 1 }
 0x188   :  { %402 = vsyncpa [#allocation9], 1 }
 0x189   :  { %403 = vsyncpa [#allocation7], 1 }

</bundles_post_ra>
